<compile_context>
chip_gen: v7x
topology: tpu7x:2x2x1
jax: 0.10.0
libtpu: 0.0.40
codegen_flags: <defaults>
</compile_context>

<pallas_src>
import functools

import jax
import jax.numpy as jnp
from jax.experimental import pallas as pl
from jax.experimental.pallas import tpu as pltpu

LANE = 128
_MiB = 1024 * 1024


def _cdiv(a, b):
    return -(-a // b)


def _round_up(x, m):
    return ((x + m - 1) // m) * m


def _round_down(x, m):
    return (x // m) * m


def _sublanes(itemsize):
    # Sublane packing of the second-minor dim: f32 -> 8, bf16 -> 16, 8-bit -> 32.
    return max(8, 32 // max(1, itemsize))


@functools.lru_cache(maxsize=1)
def _tpu_config():
    """Returns (vmem_budget_bytes, target_block_bytes, min_grid_steps, bf16_native)."""
    kind = ""
    try:
        kind = jax.devices()[0].device_kind.lower()
    except Exception:
        kind = ""
    vmem_cap = None
    try:
        vmem_cap = int(pltpu.get_tpu_info().vmem_capacity_bytes)
    except Exception:
        vmem_cap = None
    is_v7 = ("v7" in kind) or ("7x" in kind)
    if vmem_cap is None:
        # Conservative default (v7x-sized) when we cannot tell.
        vmem_cap = 64 * _MiB if (is_v7 or not kind) else 128 * _MiB
    vmem_budget = max(32 * _MiB, int(0.65 * vmem_cap))
    target_block = 8 * _MiB if vmem_cap >= 96 * _MiB else 4 * _MiB
    min_grid_steps = 2 if is_v7 else 1              # v7x: 2 TensorCores to feed
    bf16_native = is_v7 or ("v6" in kind) or ("trillium" in kind)
    return vmem_budget, target_block, min_grid_steps, bf16_native


def _vmem_limit(estimate, budget):
    return int(min(max(estimate, 16 * _MiB), budget))


def _pick_batch_tile(n, sample_bytes, target_bytes, min_grid_steps):
    """Balanced batch tile; the grid uses cdiv so bt need not divide n."""
    per = max(1, target_bytes // max(1, sample_bytes))   # samples per target block
    steps = _cdiv(n, min(n, per))
    steps = max(steps, min(min_grid_steps, n))
    return max(1, _cdiv(n, steps))


def _hard_sigmoid(x):
    # myocr/PaddleOCR hard_sigmoid: relu6(1.2*x + 3)/6 == clip(0.2*x + 0.5, 0, 1)
    return jnp.clip(0.2 * x + 0.5, 0.0, 1.0)


def _excite(pooled, w1t, b1, w2t, b2):
    """Batched SE excitation: pooled (B, C) -> scale (B, C), all f32."""
    h = jnp.dot(pooled, w1t, preferred_element_type=jnp.float32) + b1
    h = jnp.maximum(h, 0.0)
    z = jnp.dot(h, w2t, preferred_element_type=jnp.float32) + b2
    return _hard_sigmoid(z)


# ---------------------------------------------------------------------------
# Fast path: fused single-pass kernel (one read for pooling, one for scale,
# one write of the output; no host-side padding, no full-block f32 temp).
# ---------------------------------------------------------------------------
def _se_fused_kernel(x_ref, w1t_ref, b1_ref, w2t_ref, b2_ref, o_ref, *,
                     hw, scale_in_f32):
    # x_ref: (Bt, C, HW) in the input dtype; HW is the full, unpadded spatial
    # size (block dim == array dim).
    xf = x_ref[...].astype(jnp.float32)
    if hw % LANE:
        # Defensive tail-lane mask for the physically padded lanes of an
        # unaligned block before the pooled sum.
        lane = jax.lax.broadcasted_iota(jnp.int32, xf.shape, 2)
        xf = jnp.where(lane < hw, xf, 0.0)
    pooled = jnp.sum(xf, axis=2) * (1.0 / hw)                    # (Bt, C) f32
    s = _excite(pooled, w1t_ref[...], b1_ref[...], w2t_ref[...], b2_ref[...])
    # Second, independent read of x for the scale (no saved f32 block temp).
    if scale_in_f32:
        o_ref[...] = (x_ref[...].astype(jnp.float32)
                      * s[:, :, None]).astype(o_ref.dtype)
    else:
        o_ref[...] = x_ref[...] * s.astype(o_ref.dtype)[:, :, None]


def _se_single_pass(x_flat, w1t, b1, w2t, b2, hw, *, target_block_bytes,
                    vmem_budget, min_grid_steps, scale_in_f32):
    n, c, _ = x_flat.shape
    dtype = x_flat.dtype
    itemsize = jnp.dtype(dtype).itemsize
    cr = w1t.shape[1]

    # VMEM footprint of one sample's (lane/sublane padded) block buffer.
    sample_io = _round_up(c, _sublanes(itemsize)) * _round_up(hw, LANE) * itemsize
    sample_f32 = _round_up(c, 8) * _round_up(hw, LANE) * 4
    bt = _pick_batch_tile(n, sample_io, target_block_bytes, min_grid_steps)
    n_steps = _cdiv(n, bt)
    # Double-buffered in + out, plus headroom for one streamed f32 temp.
    vmem_limit = _vmem_limit(4 * bt * sample_io + bt * sample_f32 + 2 * _MiB,
                             vmem_budget)

    kernel = functools.partial(_se_fused_kernel, hw=hw,
                               scale_in_f32=scale_in_f32)
    return pl.pallas_call(
        kernel,
        out_shape=jax.ShapeDtypeStruct((n, c, hw), dtype),
        grid_spec=pltpu.PrefetchScalarGridSpec(
            num_scalar_prefetch=0,
            grid=(n_steps,),
            in_specs=[
                pl.BlockSpec((bt, c, hw), lambda i: (i, 0, 0)),   # x
                pl.BlockSpec((c, cr), lambda i: (0, 0)),          # w1^T
                pl.BlockSpec((1, cr), lambda i: (0, 0)),          # b1
                pl.BlockSpec((cr, c), lambda i: (0, 0)),          # w2^T
                pl.BlockSpec((1, c), lambda i: (0, 0)),           # b2
            ],
            out_specs=pl.BlockSpec((bt, c, hw), lambda i: (i, 0, 0)),
        ),
        compiler_params=pltpu.CompilerParams(
            dimension_semantics=("parallel",),
            vmem_limit_bytes=vmem_limit),
    )(x_flat, w1t, b1, w2t, b2)


# ---------------------------------------------------------------------------
# Fallback path: two HW-tiled passes for per-sample slabs too big for VMEM.
# ---------------------------------------------------------------------------
def _se_pool_kernel(x_ref, p_ref, acc_ref, *, hw, hw_tile):
    k = pl.program_id(1)

    @pl.when(k == 0)
    def _():
        acc_ref[...] = jnp.zeros_like(acc_ref)

    xf = x_ref[...].astype(jnp.float32)                       # (1, C, hw_tile)
    # Mask lanes past the true spatial extent: the last tile may be partial
    # and its out-of-bounds lanes are unspecified.
    lane = jax.lax.broadcasted_iota(jnp.int32, xf.shape, 2) + k * hw_tile
    xf = jnp.where(lane < hw, xf, 0.0)
    acc_ref[...] += jnp.sum(xf, axis=2)                       # (1, C)

    @pl.when(k == pl.num_programs(1) - 1)
    def _():
        p_ref[0] = acc_ref[...]


def _se_scale_kernel(x_ref, s_ref, o_ref, *, scale_in_f32):
    s = s_ref[0]                                              # (1, C) f32
    if scale_in_f32:
        o_ref[...] = (x_ref[...].astype(jnp.float32)
                      * s[:, :, None]).astype(o_ref.dtype)
    else:
        o_ref[...] = x_ref[...] * s.astype(o_ref.dtype)[:, :, None]


def _se_two_pass(x_flat, w1t, b1, w2t, b2, hw, *, target_block_bytes,
                 vmem_budget, scale_in_f32):
    n, c, _ = x_flat.shape
    dtype = x_flat.dtype
    itemsize = jnp.dtype(dtype).itemsize
    c_pad = _round_up(c, _sublanes(itemsize))

    # Lane-dense HW tile sized to ~target_block_bytes per step.  If the whole
    # row fits, use it verbatim (block dim == array dim, no alignment needed).
    lanes_budget = max(LANE, _round_down(
        target_block_bytes // max(1, c_pad * itemsize), LANE))
    hw_tile = hw if hw <= lanes_budget else lanes_budget
    n_hw = _cdiv(hw, hw_tile)

    tile_io = c_pad * _round_up(hw_tile, LANE) * itemsize
    tile_f32 = _round_up(c, 8) * _round_up(hw_tile, LANE) * 4

    # Pass 1: HW-tiled pooled-sum reduction -> (N, 1, C) sums.
    kernel1 = functools.partial(_se_pool_kernel, hw=hw, hw_tile=hw_tile)
    pooled_sum = pl.pallas_call(
        kernel1,
        out_shape=jax.ShapeDtypeStruct((n, 1, c), jnp.float32),
        grid_spec=pltpu.PrefetchScalarGridSpec(
            num_scalar_prefetch=0,
            grid=(n, n_hw),
            in_specs=[pl.BlockSpec((1, c, hw_tile), lambda i, k: (i, 0, k))],
            out_specs=pl.BlockSpec((1, 1, c), lambda i, k: (i, 0, 0)),
            scratch_shapes=[pltpu.VMEM((1, c), jnp.float32)],
        ),
        compiler_params=pltpu.CompilerParams(
            dimension_semantics=("parallel", "arbitrary"),
            vmem_limit_bytes=_vmem_limit(2 * tile_io + tile_f32 + 2 * _MiB,
                                         vmem_budget)),
    )(x_flat)

    # Tiny batched excitation (N,C)@(C,Cr): hoisted out of the reduction
    # epilogue and run as a single MXU-friendly XLA matmul.
    pooled = pooled_sum.reshape(n, c) * (1.0 / float(hw))
    s = _excite(pooled, w1t, b1, w2t, b2).reshape(n, 1, c)

    # Pass 2: HW-tiled broadcast multiply (fully parallel grid).  The partial
    # last tile's out-of-bounds lanes are never written back by Pallas.
    kernel2 = functools.partial(_se_scale_kernel, scale_in_f32=scale_in_f32)
    return pl.pallas_call(
        kernel2,
        out_shape=jax.ShapeDtypeStruct((n, c, hw), dtype),
        grid_spec=pltpu.PrefetchScalarGridSpec(
            num_scalar_prefetch=0,
            grid=(n, n_hw),
            in_specs=[
                pl.BlockSpec((1, c, hw_tile), lambda i, k: (i, 0, k)),  # x
                pl.BlockSpec((1, 1, c), lambda i, k: (i, 0, 0)),        # s
            ],
            out_specs=pl.BlockSpec((1, c, hw_tile), lambda i, k: (i, 0, k)),
        ),
        compiler_params=pltpu.CompilerParams(
            dimension_semantics=("parallel", "parallel"),
            vmem_limit_bytes=_vmem_limit(
                4 * tile_io + (tile_f32 if scale_in_f32 else 0) + 2 * _MiB,
                vmem_budget)),
    )(x_flat, s)


# ---------------------------------------------------------------------------
# Public wrapper.
# ---------------------------------------------------------------------------
def se_module(x, w1, b1, w2, b2, *,
              target_block_bytes=None,
              single_pass_budget_bytes=None):
    """SEModule forward.  x: (N, C, H, W); w1: (C//r, C); w2: (C, C//r)."""
    n, c, h, w = x.shape
    cr = w1.shape[0]
    hw = h * w
    itemsize = jnp.dtype(x.dtype).itemsize

    vmem_budget, auto_target, min_grid_steps, bf16_native = _tpu_config()
    if target_block_bytes is None:
        target_block_bytes = auto_target
    threshold = (single_pass_budget_bytes if single_pass_budget_bytes is not None
                 else vmem_budget)

    x_flat = x.reshape(n, c, hw)
    # Transposed 1x1-conv weights so the excitation runs as batched (B,C)@(C,Cr).
    w1t = jnp.transpose(w1).astype(jnp.float32)     # (C, Cr)
    w2t = jnp.transpose(w2).astype(jnp.float32)     # (Cr, C)
    b1r = b1.reshape(1, cr).astype(jnp.float32)
    b2r = b2.reshape(1, c).astype(jnp.float32)

    # v6e/v7x: bf16 inputs can be scaled in bf16 (pooling/excitation stay f32).
    scale_in_f32 = not (bf16_native and x.dtype == jnp.bfloat16)

    # Single-pass feasibility: double-buffered in+out of one sample's block
    # plus headroom for a streamed f32 temp.
    sample_io = _round_up(c, _sublanes(itemsize)) * _round_up(hw, LANE) * itemsize
    sample_f32 = _round_up(c, 8) * _round_up(hw, LANE) * 4
    single_pass_est = 4 * sample_io + sample_f32 + 2 * _MiB

    if single_pass_est <= threshold:
        out = _se_single_pass(
            x_flat, w1t, b1r, w2t, b2r, hw,
            target_block_bytes=target_block_bytes,
            vmem_budget=vmem_budget,
            min_grid_steps=min_grid_steps,
            scale_in_f32=scale_in_f32)
    else:
        # Per-sample slab too big to keep resident: two passes (pooled sums,
        # tiny XLA excitation, then HW-tiled scale).  One extra read of x,
        # but bounded VMEM.
        out = _se_two_pass(
            x_flat, w1t, b1r, w2t, b2r, hw,
            target_block_bytes=target_block_bytes,
            vmem_budget=vmem_budget,
            scale_in_f32=scale_in_f32)

    return out.reshape(n, c, h, w)


def se_module_ref(x, w1, b1, w2, b2):
    """Pure-JAX reference mirroring the PyTorch forward (f32 math)."""
    xf = x.astype(jnp.float32)
    pooled = jnp.mean(xf, axis=(2, 3), keepdims=True)                  # (N,C,1,1)
    h = jnp.einsum("oc,nchw->nohw", w1, pooled) + b1[None, :, None, None]
    h = jnp.maximum(h, 0.0)
    s = jnp.einsum("oc,nchw->nohw", w2, h) + b2[None, :, None, None]
    s = jnp.clip(1.2 * s + 3.0, 0.0, 6.0) / 6.0
    return xf * s


if __name__ == "__main__":
    # Config consistent with SEModule(in_channels=8, reduction=4).
    N, C, H, W = 2, 8, 16, 16
    reduction = 4
    Cr = C // reduction

    key = jax.random.PRNGKey(0)
    kx, kw1, kb1, kw2, kb2 = jax.random.split(key, 5)

    x = jax.random.normal(kx, (N, C, H, W), dtype=jnp.float32)
    # 1x1 conv weights: (out_ch, in_ch) — the (1,1) spatial dims are squeezed.
    w1 = jax.random.normal(kw1, (Cr, C), dtype=jnp.float32) * 0.1
    b1 = jax.random.normal(kb1, (Cr,), dtype=jnp.float32) * 0.1
    w2 = jax.random.normal(kw2, (C, Cr), dtype=jnp.float32) * 0.1
    b2 = jax.random.normal(kb2, (C,), dtype=jnp.float32) * 0.1

    ref = se_module_ref(x, w1, b1, w2, b2)

    # 1) Fused single-pass path (default).
    out = jax.block_until_ready(se_module(x, w1, b1, w2, b2))
    assert out.shape == (N, C, H, W)
    assert jnp.allclose(out, ref, atol=1e-5, rtol=1e-5), "single-pass mismatch"

    # 2) Two-pass (HW-tiled) fallback, forced at small shape (hw_tile=128,
    #    two reduction tiles).
    out2 = jax.block_until_ready(
        se_module(x, w1, b1, w2, b2,
                  single_pass_budget_bytes=0,
                  target_block_bytes=C * 128 * 4))
    assert jnp.allclose(out2, ref, atol=1e-5, rtol=1e-5), "two-pass mismatch"

    # 3) bf16 I/O + non-128-multiple spatial size (unpadded fused path).
    x3 = jax.random.normal(kx, (4, C, 10, 10), dtype=jnp.bfloat16)
    out3 = jax.block_until_ready(se_module(x3, w1, b1, w2, b2))
    ref3 = se_module_ref(x3, w1, b1, w2, b2)
    assert out3.dtype == jnp.bfloat16
    assert jnp.allclose(out3.astype(jnp.float32), ref3, atol=2e-2, rtol=2e-2), \
        "bf16/padded mismatch"

    # 4) Two-pass fallback with a partial last HW tile (hw=324, tile=128):
    #    exercises the iota<hw mask and the masked tail writeback.
    x4 = jax.random.normal(kx, (2, C, 18, 18), dtype=jnp.float32)
    out4 = jax.block_until_ready(
        se_module(x4, w1, b1, w2, b2,
                  single_pass_budget_bytes=0,
                  target_block_bytes=C * 128 * 4))
    ref4 = se_module_ref(x4, w1, b1, w2, b2)
    assert jnp.allclose(out4, ref4, atol=1e-5, rtol=1e-5), "partial-tile mismatch"

    # 5) Fused path with a non-divisor batch tile (N=3, bt=2 -> cdiv grid).
    x5 = jax.random.normal(kx, (3, C, H, W), dtype=jnp.float32)
    out5 = jax.block_until_ready(
        se_module(x5, w1, b1, w2, b2,
                  target_block_bytes=2 * C * 256 * 4))
    ref5 = se_module_ref(x5, w1, b1, w2, b2)
    assert jnp.allclose(out5, ref5, atol=1e-5, rtol=1e-5), "partial-batch mismatch"

    print("KERNEL_OK")
</pallas_src>

<mosaic_0001>
module attributes {stable_mosaic.version = 11 : i64} {
  func.func @_se_fused_kernel(%arg0: i32, %arg1: memref<2x8x256xf32, #tpu.memory_space<vmem>>, %arg2: memref<8x2xf32, #tpu.memory_space<vmem>>, %arg3: memref<1x2xf32, #tpu.memory_space<vmem>>, %arg4: memref<2x8xf32, #tpu.memory_space<vmem>>, %arg5: memref<1x8xf32, #tpu.memory_space<vmem>>, %arg6: memref<2x8x256xf32, #tpu.memory_space<vmem>>) attributes {dimension_semantics = [#tpu.dimension_semantics<parallel>], iteration_bounds = array<i64: 1>, scalar_prefetch = 0 : i64, scratch_operands = 0 : i64, tpu.core_type = #tpu.core_type<tc>, window_params = [{transform_indices = @transform_0, window_bounds = array<i64: 2, 8, 256>}, {pipeline_mode = #tpu.pipeline_mode<synchronous>, transform_indices = @transform_1, window_bounds = array<i64: 8, 2>}, {pipeline_mode = #tpu.pipeline_mode<synchronous>, transform_indices = @transform_2, window_bounds = array<i64: 1, 2>}, {pipeline_mode = #tpu.pipeline_mode<synchronous>, transform_indices = @transform_3, window_bounds = array<i64: 2, 8>}, {pipeline_mode = #tpu.pipeline_mode<synchronous>, transform_indices = @transform_4, window_bounds = array<i64: 1, 8>}, {transform_indices = @transform_5, window_bounds = array<i64: 2, 8, 256>}]} {
    %c0 = arith.constant 0 : index
    %c0_0 = arith.constant 0 : index
    %c0_1 = arith.constant 0 : index
    %0 = vector.load %arg1[%c0, %c0_0, %c0_1] : memref<2x8x256xf32, #tpu.memory_space<vmem>>, vector<2x8x256xf32>
    %cst = arith.constant dense<0.000000e+00> : vector<2x8xf32>
    %1 = vector.multi_reduction <add>, %0, %cst [2] : vector<2x8x256xf32> to vector<2x8xf32>
    %cst_2 = arith.constant 3.906250e-03 : f32
    %2 = vector.broadcast %cst_2 : f32 to vector<2x8xf32>
    %3 = arith.mulf %1, %2 : vector<2x8xf32>
    %c0_3 = arith.constant 0 : index
    %c0_4 = arith.constant 0 : index
    %4 = vector.load %arg2[%c0_3, %c0_4] : memref<8x2xf32, #tpu.memory_space<vmem>>, vector<8x2xf32>
    %c0_5 = arith.constant 0 : index
    %c0_6 = arith.constant 0 : index
    %5 = vector.load %arg3[%c0_5, %c0_6] : memref<1x2xf32, #tpu.memory_space<vmem>>, vector<1x2xf32>
    %c0_7 = arith.constant 0 : index
    %c0_8 = arith.constant 0 : index
    %6 = vector.load %arg4[%c0_7, %c0_8] : memref<2x8xf32, #tpu.memory_space<vmem>>, vector<2x8xf32>
    %c0_9 = arith.constant 0 : index
    %c0_10 = arith.constant 0 : index
    %7 = vector.load %arg5[%c0_9, %c0_10] : memref<1x8xf32, #tpu.memory_space<vmem>>, vector<1x8xf32>
    %cst_11 = arith.constant dense<0.000000e+00> : vector<2x2xf32>
    %8 = tpu.matmul %3, %4, %cst_11 {dimension_numbers = #tpu.dot_dimension_numbers<[1], [0], [0], [1], [0, 0, 1, 1], [], []>} : vector<2x8xf32>, vector<8x2xf32>, vector<2x2xf32> -> vector<2x2xf32>
    %9 = vector.broadcast %5 : vector<1x2xf32> to vector<2x2xf32>
    %10 = arith.addf %8, %9 : vector<2x2xf32>
    %cst_12 = arith.constant 0.000000e+00 : f32
    %11 = vector.broadcast %cst_12 : f32 to vector<2x2xf32>
    %12 = arith.maximumf %10, %11 : vector<2x2xf32>
    %cst_13 = arith.constant dense<0.000000e+00> : vector<2x8xf32>
    %13 = tpu.matmul %12, %6, %cst_13 {dimension_numbers = #tpu.dot_dimension_numbers<[1], [0], [0], [1], [0, 0, 1, 1], [], []>} : vector<2x2xf32>, vector<2x8xf32>, vector<2x8xf32> -> vector<2x8xf32>
    %14 = vector.broadcast %7 : vector<1x8xf32> to vector<2x8xf32>
    %15 = arith.addf %13, %14 : vector<2x8xf32>
    %cst_14 = arith.constant 2.000000e-01 : f32
    %16 = vector.broadcast %cst_14 : f32 to vector<2x8xf32>
    %17 = arith.mulf %16, %15 : vector<2x8xf32>
    %cst_15 = arith.constant 5.000000e-01 : f32
    %18 = vector.broadcast %cst_15 : f32 to vector<2x8xf32>
    %19 = arith.addf %17, %18 : vector<2x8xf32>
    %cst_16 = arith.constant 0.000000e+00 : f32
    %cst_17 = arith.constant 1.000000e+00 : f32
    %20 = vector.broadcast %cst_16 : f32 to vector<2x8xf32>
    %21 = arith.maximumf %20, %19 : vector<2x8xf32>
    %22 = vector.broadcast %cst_17 : f32 to vector<2x8xf32>
    %23 = arith.minimumf %22, %21 : vector<2x8xf32>
    %c0_18 = arith.constant 0 : index
    %c0_19 = arith.constant 0 : index
    %c0_20 = arith.constant 0 : index
    %24 = vector.load %arg1[%c0_18, %c0_19, %c0_20] : memref<2x8x256xf32, #tpu.memory_space<vmem>>, vector<2x8x256xf32>
    %25 = vector.shape_cast %23 : vector<2x8xf32> to vector<2x8x1xf32>
    %26 = vector.broadcast %25 : vector<2x8x1xf32> to vector<2x8x256xf32>
    %27 = arith.mulf %24, %26 : vector<2x8x256xf32>
    %c0_21 = arith.constant 0 : index
    %c0_22 = arith.constant 0 : index
    %c0_23 = arith.constant 0 : index
    %28 = vector.load %arg6[%c0_21, %c0_22, %c0_23] : memref<2x8x256xf32, #tpu.memory_space<vmem>>, vector<2x8x256xf32>
    tpu.vector_store %arg6[%c0_21, %c0_22, %c0_23], %27 {strides = array<i32>} : memref<2x8x256xf32, #tpu.memory_space<vmem>>, vector<2x8x256xf32>,
    return
  }
  func.func @transform_0(%arg0: i32) -> (i32, i32, i32) {
    %c0_i32 = arith.constant 0 : i32
    %c0_i32_0 = arith.constant 0 : i32
    %c0_i32_1 = arith.constant 0 : i32
    return %arg0, %c0_i32, %c0_i32_0 : i32, i32, i32
  }
  func.func @transform_1(%arg0: i32) -> (i32, i32) {
    %c0_i32 = arith.constant 0 : i32
    %c0_i32_0 = arith.constant 0 : i32
    %c0_i32_1 = arith.constant 0 : i32
    return %c0_i32, %c0_i32_0 : i32, i32
  }
  func.func @transform_2(%arg0: i32) -> (i32, i32) {
    %c0_i32 = arith.constant 0 : i32
    %c0_i32_0 = arith.constant 0 : i32
    %c0_i32_1 = arith.constant 0 : i32
    return %c0_i32, %c0_i32_0 : i32, i32
  }
  func.func @transform_3(%arg0: i32) -> (i32, i32) {
    %c0_i32 = arith.constant 0 : i32
    %c0_i32_0 = arith.constant 0 : i32
    %c0_i32_1 = arith.constant 0 : i32
    return %c0_i32, %c0_i32_0 : i32, i32
  }
  func.func @transform_4(%arg0: i32) -> (i32, i32) {
    %c0_i32 = arith.constant 0 : i32
    %c0_i32_0 = arith.constant 0 : i32
    %c0_i32_1 = arith.constant 0 : i32
    return %c0_i32, %c0_i32_0 : i32, i32
  }
  func.func @transform_5(%arg0: i32) -> (i32, i32, i32) {
    %c0_i32 = arith.constant 0 : i32
    %c0_i32_0 = arith.constant 0 : i32
    %c0_i32_1 = arith.constant 0 : i32
    return %arg0, %c0_i32, %c0_i32_0 : i32, i32, i32
  }
}

</mosaic_0001>

<bundles_post_ra>
// kernel: tpu_custom_call.1
= control target key start
LH: loop header
LB: loop body
LE: loop exit
PB: predicated region body
PF: predicated region fallthrough
CT: control target
= control target key end

     0   :  { %10 = vsyncpa [#allocation3], 0  ;;  %s423_s0 = inlined_call_operand.hbm [shape: f32[2,8,256], index: 0, kind: input, shape index: {}]   ;;  %s424_s1 = inlined_call_operand.vmem [shape: f32[8,2], index: 1, kind: input, shape index: {}]   ;;  %s425_s2 = inlined_call_operand.vmem [shape: f32[1,2], index: 2, kind: input, shape index: {}]   ;;  %s426_s3 = inlined_call_operand.vmem [shape: f32[2,8], index: 3, kind: input, shape index: {}]   ;;  %s427_s4 = inlined_call_operand.vmem [shape: f32[1,8], index: 4, kind: input, shape index: {}]   ;;  %s428_s5 = inlined_call_operand.hbm [shape: f32[2,8,256], index: 5, kind: output, shape index: {}]  }
   0x1   :  { %11 = vsyncpa [#allocation4], 0  ;;  %s345_s18 = smov [#allocation2]   ;;  %s297_s22 = scalar_lea.hbm %s423_s0, 512 }
   0x2   :  { %s17_s19 = sshll.u32 %s345_s18, 4  ;;  %p298_p0 = scmp.ne.s32.totalorder %s423_s0, %s297_s22  ;;  %s18_s19 = int_to_ptr.vmem [resolvable:$true] %s17_s19 }
   0x3   :  { %p301_p1 = scmp.lt.u32.totalorder %s297_s22, %s423_s0 }
   0x5   :  { %p303_p2 = pnand %p301_p1, %p298_p0 }
   0x7   :  { %306 = shalt.err (!%p303_p2)
}
   0x8   :  { %s307_s27 = scalar_lea.vmem %s18_s19, 512  ;;  %p312_p4 = scmp.lt.s32.totalorder %s18_s19, %s18_s19 }
   0x9   :  { %p308_p3 = scmp.ne.s32.totalorder %s18_s19, %s307_s27  ;;  %p313_p5 = scmp.lt.s32.totalorder %s307_s27, %s307_s27 }
   0xb   :  { %p314_p6 = por %p313_p5, %p312_p4 }
   0xd   :  { %p315_p7 = pnand %p314_p6, %p308_p3 }
   0xf   :  { %318 = shalt.err (!%p315_p7)
}
  0x10   :  { %s346_s28 = smov 256   ;;  %s347_s29 = smov 16  }
  0x11   :  { %23 = dma.hbm_to_vmem [thread:$0]  %s423_s0, 512, %s18_s19, [#allocation3], %s346_s28, %s346_s28, %s347_s29  }
  0x12   :  { %341 = dma.done.wait [#allocation3], 512  }
  0x13   :  { %342 = vsyncadd [#allocation3], 4294966784  ;;  %v35_v0 = vld [vmem:[#allocation2] sm:$0xff]  ;;  %v36_v1 = vld [vmem:[#allocation2 + $0x8] sm:$0xff]  ;;  %v348_v7 = vmov 0.0   ;;  %vm349_vm0 = vmmov 0   ;;  %v59_v8 = vlaneseq }
  0x14   :  { %v37_v2 = vld [vmem:[#allocation2 + $0x10] sm:$0xff]  ;;  %v39_v3 = vadd.f32 %v36_v1, %v35_v0  ;;  %v38_v4 = vld [vmem:[#allocation2 + $0x18] sm:$0xff]  ;;  %v47_v6 = vld [vmem:[%s424_s1] sm:$0xff]  ;;  %281 = vmatprep.subr.mxu0 %v348_v7  ;;  %283 = vmatprep.mubr.msk.f32.mxu0 %vm349_vm0, %v348_v7  ;;  %vm69_vm1 = vcmask 1041409   ;;  %vm71_vm2 = vcmask 64512   ;;  %vm155_vm3 = vcmask 1041408  }
  0x15   :  { %v42_v5 = vadd.f32 %v38_v4, %v37_v2  ;;  %282 = vmatpush3.msra.mxu0 %v47_v6  ;;  %286 = vmatprep.subr.mxu1 %v348_v7  ;;  %v60_v9 = vand.u32 127, %v59_v8  ;;  %v62_v10 = vshrl.u32 %v59_v8, 7  ;;  %v49_v19 = vld [vmem:[%s426_s3] sm:$0x3]  ;;  %vm151_vm4 = vcmask 15360  }
  0x16   :  { %40 = vadd.xlane.f32.xlu0 %v39_v3  ;;  %288 = vmatprep.mubr.msk.f32.mxu1 %vm349_vm0, %v348_v7  ;;  %v272_v20 = vld [vmem:[%s425_s2] ss:$0 sm:$0xff]  ;;  %s350_s2 = smov [#allocation5]  }
  0x17   :  { %v63_v12 = vsub.s32 %v60_v9, %v62_v10  ;;  %287 = vmatpush3.msk.msra.mxu1 %vm155_vm3, %v49_v19  ;;  %v274_v25 = vld [vmem:[%s427_s4] ss:$0 sm:$0xff]  ;;  %v235_v32 = vsub.s32 0, %v62_v10  ;;  %v242_v35 = vsub.s32 1, %v62_v10  ;;  %s260_s3 = sshll.u32 %s350_s2, 4  ;;  %s261_s3 = int_to_ptr.vmem [resolvable:$true] %s260_s3 }
  0x18   :  { %s319_s4 = scalar_lea.vmem %s261_s3, 512  ;;  %p324_p9 = scmp.lt.s32.totalorder %s261_s3, %s261_s3 }
  0x19   :  { %p320_p8 = scmp.ne.s32.totalorder %s261_s3, %s319_s4  ;;  %p325_p10 = scmp.lt.s32.totalorder %s319_s4, %s319_s4 }
  0x1a   :  { %43 = vadd.xlane.f32.xlu0 %v42_v5 }
  0x1b   :  { %p326_p11 = por %p325_p10, %p324_p9 }
  0x1d   :  { %p327_p12 = pnand %p326_p11, %p320_p8 }
  0xa3   :  { %v41_v11 = vpop.xlane.xlu0 %40 }
  0xa4   :  { %v45_v13 = vmul.f32 0.00390625, %v41_v11 }
  0xa6   :  { %v64_v16 = vrot.slane %v45_v13, %v63_v12 }
  0xa7   :  { %v44_v14 = vpop.xlane.xlu0 %43 }
  0xa8   :  { %v46_v15 = vmul.f32 0.00390625, %v44_v14 }
  0xaa   :  { %v68_v17 = vrot.slane %v46_v15, %v63_v12 }
  0xac   :  { %v70_v18 = vsel %vm69_vm1, %v68_v17, %v64_v16 }
  0xad   :  { %284 = vmatmul.mubr.msk.f32.vlgmr.msra.gmra.mrb[0].mxu0 %vm71_vm2, %v70_v18 }
 0x180   :  { %v140_v21 = vpop.f32.mrb[0].mxu0 }
 0x181   :  { %v141_v22 = vadd.f32 %v272_v20, %v140_v21  ;;  %v285_v23 = vpop.f32.mrb[1].mxu0 }
 0x183   :  { %v144_v24 = vmax.f32 %v141_v22, 0.0 }
 0x185   :  { %289 = vmatmul.mubr.msk.f32.vlgmr.msra.gmra.mrb[0].mxu1 %vm151_vm4, %v144_v24 }
 0x258   :  { %v225_v26 = vpop.f32.mrb[0].mxu1 }
 0x259   :  { %v226_v27 = vadd.f32 %v274_v25, %v225_v26  ;;  %v290_v28 = vpop.f32.mrb[1].mxu1 }
 0x25b   :  { %v229_v29 = vmul.f32 0.2, %v226_v27 }
 0x25d   :  { %v230_v30 = vadd.f32 0.5, %v229_v29 }
 0x25f   :  { %v231_v31 = vmax.f32 %v230_v30, 0.0 }
 0x261   :  { %v232_v33 = vmin.f32 %v231_v31, 1.0 }
 0x263   :  { %v236_v34 = vrot.slane %v232_v33, %v235_v32  ;;  %v243_v36 = vrot.slane %v232_v33, %v242_v35 }
 0x265   :  { %238 = vbcast.lane.b32.xlu1 %v236_v34, 256 }
 0x269   :  { %245 = vbcast.lane.b32.xlu1 %v243_v36, 256 }
 0x2d7   :  { %v239_v37 = vpop.permute.xlu1 %238 }
 0x2d8   :  { %v247_v38 = vmul.f32 %v239_v37, %v35_v0  ;;  %v248_v39 = vmul.f32 %v239_v37, %v36_v1 }
 0x2da   :  { %251 = vst [vmem:[#allocation5] sm:$0xff] %v247_v38  ;;  %252 = vst [vmem:[#allocation5 + $0x8] sm:$0xff] %v248_v39 }
 0x2db   :  { %v246_v40 = vpop.permute.xlu1 %245 }
 0x2dc   :  { %v249_v41 = vmul.f32 %v246_v40, %v37_v2  ;;  %v250_v42 = vmul.f32 %v246_v40, %v38_v4 }
 0x2de   :  { %253 = vst [vmem:[#allocation5 + $0x10] sm:$0xff] %v249_v41  ;;  %254 = vst [vmem:[#allocation5 + $0x18] sm:$0xff] %v250_v42 }
 0x2df   :  { %330 = shalt.err (!%p327_p12)
}
 0x2e0   :  { %s331_s15 = scalar_lea.hbm %s428_s5, 512 }
 0x2e1   :  { %p332_p13 = scmp.ne.s32.totalorder %s428_s5, %s331_s15  ;;  %p335_p0 = scmp.lt.u32.totalorder %s331_s15, %s428_s5 }
 0x2e3   :  { %p337_p1 = pnand %p335_p0, %p332_p13 }
 0x2e5   :  { %340 = shalt.err (!%p337_p1)
}
 0x2e6   :  { %266 = dma.vmem_to_hbm [thread:$0]  %s261_s3, 512, %s428_s5, [#allocation4], %s346_s28, %s346_s28, %s347_s29  }
 0x2e7   :  { %343 = dma.done.wait [#allocation4], 512  }
 0x2e8   :  { %344 = vsyncadd [#allocation4], 4294966784 }
 0x2e9   :  { %270 = vsyncpa [#allocation3], 1 }
 0x2ea   :  { %271 = vsyncpa [#allocation4], 1 }

</bundles_post_ra>
